<compile_context>
chip_gen: v5e
topology: v5e:2x2
jax: 0.10.0
libtpu: 0.0.40
codegen_flags: <defaults>
</compile_context>

<pallas_src>
import numpy as np
import jax
import jax.numpy as jnp
from jax.experimental import pallas as pl
from jax.experimental.pallas import tpu as pltpu

# Problem sizes (from the PyTorch module's args).
N = 16      # number of graph nodes
F_IN = 4    # num_static_node_features
T_IN = 8    # num_timesteps_in  (A3TGCN out_channels == TGCN hidden size)
T_OUT = 4   # num_timesteps_out (== periods and final Linear output size)

PF = T_OUT * F_IN    # 16 : per-node features, all periods packed along lanes
PT = T_OUT * T_IN    # 32 : per-node gate outputs, all periods packed

# --- constant-slab layout (every block starts on a sublane multiple of 8) ---
_r8 = lambda v: ((v + 7) // 8) * 8
A_R0 = 0                       # a_hat               (N , N )
WZ_R0 = _r8(N)                 # block-diag z weight (PF, PT)
WH_R0 = WZ_R0 + _r8(PF)        # block-diag h weight (PF, PT)
S_R0 = WH_R0 + _r8(PF)         # attention selector  (PT, T_IN)
WO_R0 = S_R0 + _r8(PT)         # output Linear W^T   (T_IN, T_OUT)
BZ_R = WO_R0 + _r8(T_IN)       # z bias row          (1, PT)
BH_R = BZ_R + 1                # h bias row          (1, PT)
BO_R = BZ_R + 2                # output bias row     (1, T_OUT)
SLAB_ROWS = _r8(BO_R + 1)      # 96
SLAB_COLS = 128                # lane-dense slab


# ---------------------------------------------------------------------------
# Pallas kernel: entire forward in a single gridless invocation.  The problem
# is a few KiB, so all operands live whole in VMEM; constants are static
# slices of one packed slab ref (zero-cost views).
# ---------------------------------------------------------------------------
def tgnn_kernel(x_ref, c_ref, out_ref):
    # x_ref: (N, PF)  node features, periods packed along lanes
    # c_ref: (SLAB_ROWS, 128) packed constants
    x = x_ref[...]

    # GCN aggregation, reassociated as (A X) W: (16,16)@(16,16) first.
    a_hat = c_ref[A_R0:A_R0 + N, 0:N]
    ax = jnp.dot(a_hat, x, preferred_element_type=jnp.float32)          # (N, PF)

    # z / h gate pre-activations for every period in two fat matmuls
    # (separate z and h weight blocks: no mid-vreg lane split needed).
    w_z = c_ref[WZ_R0:WZ_R0 + PF, 0:PT]
    w_h = c_ref[WH_R0:WH_R0 + PF, 0:PT]
    b_z = c_ref[BZ_R:BZ_R + 1, 0:PT]
    b_h = c_ref[BH_R:BH_R + 1, 0:PT]
    z = jax.nn.sigmoid(jnp.dot(ax, w_z, preferred_element_type=jnp.float32) + b_z)
    ht = jnp.tanh(jnp.dot(ax, w_h, preferred_element_type=jnp.float32) + b_h)
    h_all = (1.0 - z) * ht                                               # (N, PT)

    # Attention-weighted sum over periods: one matmul with S = kron(probs, I_T).
    s_mat = c_ref[S_R0:S_R0 + PT, 0:T_IN]
    acc = jnp.dot(h_all, s_mat, preferred_element_type=jnp.float32)      # (N, T_IN)

    h = jnp.maximum(acc, 0.0)                                            # F.relu
    w_out = c_ref[WO_R0:WO_R0 + T_IN, 0:T_OUT]
    b_out = c_ref[BO_R:BO_R + 1, 0:T_OUT]
    out_ref[...] = jnp.dot(h, w_out, preferred_element_type=jnp.float32) + b_out


# ---------------------------------------------------------------------------
# Host-side constant building (run ONCE per graph / weight set, hoisted out
# of the per-call path).
# ---------------------------------------------------------------------------
def gcn_norm_dense_np(edge_index, edge_weight, num_nodes):
    """add_remaining_self_loops(fill=1.0) + symmetric normalisation (dense)."""
    src = np.asarray(edge_index[0])
    dst = np.asarray(edge_index[1])
    w = np.asarray(edge_weight, np.float32)
    a = np.zeros((num_nodes, num_nodes), np.float32)
    np.add.at(a, (dst, src), w)
    diag = np.diagonal(a).copy()
    idx = np.arange(num_nodes)
    a[idx, idx] += np.where(diag == 0.0, 1.0, 0.0)
    deg = a.sum(axis=1)
    d_inv_sqrt = np.where(deg > 0.0, 1.0 / np.sqrt(deg), 0.0)
    return d_inv_sqrt[:, None] * a * d_inv_sqrt[None, :]


def build_constant_slab(a_hat, params):
    """Fold GCNConv into the gate Linears (H==0 -> only conv half survives),
    build block-diagonal per-period weights, the attention selector and the
    output Linear, and pack everything into one f32 slab."""
    p = {k: np.asarray(v, np.float32) for k, v in params.items()}

    def fold(w_g, b_g, w_l, b_l):
        wl_top = w_l.T[:T_IN, :]                                   # (T, T)
        w_c = w_g.T @ wl_top                                       # (F, T)
        b_c = b_g.reshape(1, -1) @ wl_top + b_l.reshape(1, -1)     # (1, T)
        return w_c, b_c

    wc_z, bc_z = fold(p["wz_g"], p["bz_g"], p["wz_l"], p["bz_l"])
    wc_h, bc_h = fold(p["wh_g"], p["bh_g"], p["wh_l"], p["bh_l"])

    eye_p = np.eye(T_OUT, dtype=np.float32)
    w_z_big = np.kron(eye_p, wc_z)                                 # (PF, PT)
    w_h_big = np.kron(eye_p, wc_h)
    b_z_big = np.tile(bc_z, (1, T_OUT))                            # (1, PT)
    b_h_big = np.tile(bc_h, (1, T_OUT))

    att = p["attention"]
    e = np.exp(att - att.max())
    probs = e / e.sum()                                            # softmax
    s_mat = np.kron(probs.reshape(T_OUT, 1),
                    np.eye(T_IN, dtype=np.float32))                # (PT, T_IN)

    slab = np.zeros((SLAB_ROWS, SLAB_COLS), np.float32)
    slab[A_R0:A_R0 + N, 0:N] = np.asarray(a_hat, np.float32)
    slab[WZ_R0:WZ_R0 + PF, 0:PT] = w_z_big
    slab[WH_R0:WH_R0 + PF, 0:PT] = w_h_big
    slab[S_R0:S_R0 + PT, 0:T_IN] = s_mat
    slab[WO_R0:WO_R0 + T_IN, 0:T_OUT] = p["lin_w"].T
    slab[BZ_R, 0:PT] = b_z_big[0]
    slab[BH_R, 0:PT] = b_h_big[0]
    slab[BO_R, 0:T_OUT] = p["lin_b"]
    return jnp.asarray(slab)


# ---------------------------------------------------------------------------
# Per-call forward: pack x (periods along lanes) and launch one kernel.
# ---------------------------------------------------------------------------
_COST = pl.CostEstimate(
    flops=2 * (N * N * PF + 2 * N * PF * PT + N * PT * T_IN + N * T_IN * T_OUT),
    transcendentals=2 * N * PT,
    bytes_accessed=4 * (N * PF + SLAB_ROWS * SLAB_COLS + N * T_OUT),
)


@jax.jit
def temporal_gnn_forward(x, const_slab):
    n, f_in, periods = x.shape
    x_packed = jnp.transpose(x, (0, 2, 1)).reshape(n, periods * f_in)
    x_packed = x_packed.astype(jnp.float32)
    # TODO(synk): if many graphs / time-windows are processed per step, stack
    # them along the node dimension and add a leading "parallel" grid axis so
    # both v7x TensorCores get work; a single tiny graph stays gridless.
    return pl.pallas_call(
        tgnn_kernel,
        out_shape=jax.ShapeDtypeStruct((n, T_OUT), jnp.float32),
        in_specs=[pl.BlockSpec(memory_space=pltpu.MemorySpace.VMEM),
                  pl.BlockSpec(memory_space=pltpu.MemorySpace.VMEM)],
        out_specs=pl.BlockSpec(memory_space=pltpu.MemorySpace.VMEM),
        cost_estimate=_COST,
        compiler_params=pltpu.CompilerParams(vmem_limit_bytes=16 * 1024 * 1024),
    )(x_packed, const_slab)


# ---------------------------------------------------------------------------
# Pure-JAX reference (mirrors the PyTorch forward exactly, incl. the dead
# r-gate / H terms) for verification.
# ---------------------------------------------------------------------------
def reference_forward(x, a_hat, params):
    n, _, periods = x.shape
    probs = jax.nn.softmax(params["attention"])

    def lin(inp, w, b):
        return inp @ w.T + b

    acc = jnp.zeros((n, T_IN), jnp.float32)
    for p in range(periods):
        xp = x[:, :, p]
        H = jnp.zeros((n, T_IN), jnp.float32)
        gcn = lambda w, b: a_hat @ (xp @ w.T) + b
        z = jax.nn.sigmoid(lin(jnp.concatenate([gcn(params["wz_g"], params["bz_g"]), H], 1),
                               params["wz_l"], params["bz_l"]))
        r = jax.nn.sigmoid(lin(jnp.concatenate([gcn(params["wr_g"], params["br_g"]), H], 1),
                               params["wr_l"], params["br_l"]))
        ht = jnp.tanh(lin(jnp.concatenate([gcn(params["wh_g"], params["bh_g"]), H * r], 1),
                          params["wh_l"], params["bh_l"]))
        acc = acc + probs[p] * (z * H + (1.0 - z) * ht)
    h = jax.nn.relu(acc)
    return lin(h, params["lin_w"], params["lin_b"])


def init_params(key):
    ks = jax.random.split(key, 16)
    u = lambda k, shape, s=0.3: jax.random.uniform(k, shape, jnp.float32, -s, s)
    return {
        # GCNConv weights (out=T_IN, in=F_IN), biases
        "wz_g": u(ks[0], (T_IN, F_IN)), "bz_g": u(ks[1], (T_IN,)),
        "wr_g": u(ks[2], (T_IN, F_IN)), "br_g": u(ks[3], (T_IN,)),
        "wh_g": u(ks[4], (T_IN, F_IN)), "bh_g": u(ks[5], (T_IN,)),
        # TGCN gate Linears (out=T_IN, in=2*T_IN)
        "wz_l": u(ks[6], (T_IN, 2 * T_IN)), "bz_l": u(ks[7], (T_IN,)),
        "wr_l": u(ks[8], (T_IN, 2 * T_IN)), "br_l": u(ks[9], (T_IN,)),
        "wh_l": u(ks[10], (T_IN, 2 * T_IN)), "bh_l": u(ks[11], (T_IN,)),
        # A3TGCN attention over periods
        "attention": jax.random.uniform(ks[12], (T_OUT,), jnp.float32, 0.0, 1.0),
        # Final torch.nn.Linear(T_IN, T_OUT)
        "lin_w": u(ks[13], (T_OUT, T_IN)), "lin_b": u(ks[14], (T_OUT,)),
    }


if __name__ == "__main__":
    key = jax.random.PRNGKey(0)
    k_x, k_w, k_p = jax.random.split(key, 3)

    # Node features: (N, F, periods) as in A3TGCN.
    x = jax.random.normal(k_x, (N, F_IN, T_OUT), jnp.float32)

    # Deterministic bidirectional ring graph (no self loops; normalisation adds them).
    src = np.concatenate([np.arange(N), np.arange(N)])
    dst = np.concatenate([(np.arange(N) + 1) % N, (np.arange(N) - 1) % N])
    edge_index = jnp.asarray(np.stack([src, dst]), dtype=jnp.int32)
    edge_weight = jax.random.uniform(k_w, (edge_index.shape[1],), jnp.float32, 0.5, 1.5)

    params = init_params(k_p)

    # Hoisted, run once: dense normalised adjacency + packed constant slab.
    a_hat = gcn_norm_dense_np(np.asarray(edge_index), np.asarray(edge_weight), N)
    const_slab = build_constant_slab(a_hat, params)

    out = jax.block_until_ready(temporal_gnn_forward(x, const_slab))
    ref = jax.block_until_ready(reference_forward(x, jnp.asarray(a_hat), params))

    np.testing.assert_allclose(np.asarray(out), np.asarray(ref), rtol=1e-3, atol=1e-3)
    assert out.shape == (N, T_OUT)
    print("KERNEL_OK")
</pallas_src>

<mosaic_0001>
module attributes {stable_mosaic.version = 11 : i64} {
  func.func @tgnn_kernel(%arg0: memref<16x16xf32, #tpu.memory_space<vmem>>, %arg1: memref<96x128xf32, #tpu.memory_space<vmem>>, %arg2: memref<16x4xf32, #tpu.memory_space<vmem>>) attributes {dimension_semantics = [], scalar_prefetch = 0 : i64, scratch_operands = 0 : i64, tpu.core_type = #tpu.core_type<tc>} {
    %c0 = arith.constant 0 : index
    %c0_0 = arith.constant 0 : index
    %0 = vector.load %arg0[%c0, %c0_0] : memref<16x16xf32, #tpu.memory_space<vmem>>, vector<16x16xf32>
    %c0_1 = arith.constant 0 : index
    %c0_2 = arith.constant 0 : index
    %1 = vector.load %arg1[%c0_1, %c0_2] : memref<96x128xf32, #tpu.memory_space<vmem>>, vector<16x16xf32>
    %cst = arith.constant dense<0.000000e+00> : vector<16x16xf32>
    %2 = tpu.matmul %1, %0, %cst {dimension_numbers = #tpu.dot_dimension_numbers<[1], [0], [0], [1], [0, 0, 1, 1], [], []>} : vector<16x16xf32>, vector<16x16xf32>, vector<16x16xf32> -> vector<16x16xf32>
    %c16 = arith.constant 16 : index
    %c0_3 = arith.constant 0 : index
    %3 = vector.load %arg1[%c16, %c0_3] : memref<96x128xf32, #tpu.memory_space<vmem>>, vector<16x32xf32>
    %c32 = arith.constant 32 : index
    %c0_4 = arith.constant 0 : index
    %4 = vector.load %arg1[%c32, %c0_4] : memref<96x128xf32, #tpu.memory_space<vmem>>, vector<16x32xf32>
    %c88 = arith.constant 88 : index
    %c0_5 = arith.constant 0 : index
    %5 = vector.load %arg1[%c88, %c0_5] : memref<96x128xf32, #tpu.memory_space<vmem>>, vector<1x32xf32>
    %c89 = arith.constant 89 : index
    %c0_6 = arith.constant 0 : index
    %6 = vector.load %arg1[%c89, %c0_6] : memref<96x128xf32, #tpu.memory_space<vmem>>, vector<1x32xf32>
    %cst_7 = arith.constant dense<0.000000e+00> : vector<16x32xf32>
    %7 = tpu.matmul %2, %3, %cst_7 {dimension_numbers = #tpu.dot_dimension_numbers<[1], [0], [0], [1], [0, 0, 1, 1], [], []>} : vector<16x16xf32>, vector<16x32xf32>, vector<16x32xf32> -> vector<16x32xf32>
    %8 = vector.broadcast %5 : vector<1x32xf32> to vector<16x32xf32>
    %9 = arith.addf %7, %8 : vector<16x32xf32>
    %10 = arith.negf %9 : vector<16x32xf32>
    %11 = math.exp %10 : vector<16x32xf32>
    %cst_8 = arith.constant 1.000000e+00 : f32
    %12 = vector.broadcast %cst_8 : f32 to vector<16x32xf32>
    %13 = arith.addf %12, %11 : vector<16x32xf32>
    %14 = arith.divf %12, %13 : vector<16x32xf32>
    %cst_9 = arith.constant dense<0.000000e+00> : vector<16x32xf32>
    %15 = tpu.matmul %2, %4, %cst_9 {dimension_numbers = #tpu.dot_dimension_numbers<[1], [0], [0], [1], [0, 0, 1, 1], [], []>} : vector<16x16xf32>, vector<16x32xf32>, vector<16x32xf32> -> vector<16x32xf32>
    %16 = vector.broadcast %6 : vector<1x32xf32> to vector<16x32xf32>
    %17 = arith.addf %15, %16 : vector<16x32xf32>
    %18 = math.tanh %17 : vector<16x32xf32>
    %cst_10 = arith.constant 1.000000e+00 : f32
    %19 = vector.broadcast %cst_10 : f32 to vector<16x32xf32>
    %20 = arith.subf %19, %14 : vector<16x32xf32>
    %21 = arith.mulf %20, %18 : vector<16x32xf32>
    %c48 = arith.constant 48 : index
    %c0_11 = arith.constant 0 : index
    %22 = vector.load %arg1[%c48, %c0_11] : memref<96x128xf32, #tpu.memory_space<vmem>>, vector<32x8xf32>
    %cst_12 = arith.constant dense<0.000000e+00> : vector<16x8xf32>
    %23 = tpu.matmul %21, %22, %cst_12 {dimension_numbers = #tpu.dot_dimension_numbers<[1], [0], [0], [1], [0, 0, 1, 1], [], []>} : vector<16x32xf32>, vector<32x8xf32>, vector<16x8xf32> -> vector<16x8xf32>
    %cst_13 = arith.constant 0.000000e+00 : f32
    %24 = vector.broadcast %cst_13 : f32 to vector<16x8xf32>
    %25 = arith.maximumf %23, %24 : vector<16x8xf32>
    %c80 = arith.constant 80 : index
    %c0_14 = arith.constant 0 : index
    %26 = vector.load %arg1[%c80, %c0_14] : memref<96x128xf32, #tpu.memory_space<vmem>>, vector<8x4xf32>
    %c90 = arith.constant 90 : index
    %c0_15 = arith.constant 0 : index
    %27 = vector.load %arg1[%c90, %c0_15] : memref<96x128xf32, #tpu.memory_space<vmem>>, vector<1x4xf32>
    %cst_16 = arith.constant dense<0.000000e+00> : vector<16x4xf32>
    %28 = tpu.matmul %25, %26, %cst_16 {dimension_numbers = #tpu.dot_dimension_numbers<[1], [0], [0], [1], [0, 0, 1, 1], [], []>} : vector<16x8xf32>, vector<8x4xf32>, vector<16x4xf32> -> vector<16x4xf32>
    %29 = vector.broadcast %27 : vector<1x4xf32> to vector<16x4xf32>
    %30 = arith.addf %28, %29 : vector<16x4xf32>
    %c0_17 = arith.constant 0 : index
    %c0_18 = arith.constant 0 : index
    %31 = vector.load %arg2[%c0_17, %c0_18] : memref<16x4xf32, #tpu.memory_space<vmem>>, vector<16x4xf32>
    tpu.vector_store %arg2[%c0_17, %c0_18], %30 {strides = array<i32>} : memref<16x4xf32, #tpu.memory_space<vmem>>, vector<16x4xf32>,
    return
  }
}

</mosaic_0001>

<bundles_post_ra>
// kernel: temporal_gnn_forward.1
= control target key start
LH: loop header
LB: loop body
LE: loop exit
PB: predicated region body
PF: predicated region fallthrough
CT: control target
= control target key end

     0   :  { %7 = vsyncpa [#allocation3], 0  ;;  %s300_s12 = smov [#allocation2]   ;;  %s301_s14 = smov 128   ;;  %s341_s0 = inlined_call_operand.vmem [shape: f32[16,16], index: 0, kind: input, shape index: {}]   ;;  %s342_s1 = inlined_call_operand.hbm [shape: f32[96,128], index: 1, kind: input, shape index: {}]   ;;  %s343_s2 = inlined_call_operand.vmem [shape: f32[16,4], index: 2, kind: output, shape index: {}]  }
   0x1   :  { %s14_s11 = sshll.u32 %s342_s1, 4  ;;  %s16_s13 = sshll.u32 %s300_s12, 4  ;;  %s15_s11 = int_to_ptr.hbm [resolvable:$true] %s14_s11  ;;  %s17_s13 = int_to_ptr.vmem [resolvable:$true] %s16_s13 }
   0x2   :  { %s302_s15 = smov 8  }
   0x3   :  { %22 = dma.hbm_to_vmem [thread:$0]  %s15_s11, 1536, %s17_s13, [#allocation3], %s301_s14, %s301_s14, %s302_s15  }
   0x4   :  { %298 = dma.done.wait [#allocation3], 1536  }
   0x5   :  { %299 = vsyncadd [#allocation3], 4294965760  ;;  %v28_v0 = vld [vmem:[%s341_s0 + $0x8] sm:$0xff]  ;;  %v27_v1 = vld [vmem:[%s341_s0] sm:$0xff]  ;;  %vm31_vm0 = vcmask 130048   ;;  %vm169_vm5 = vcmask 261120  }
   0x6   :  { %52 = vmatpush.msra.mxu0 %v28_v0  ;;  %v29_v2 = vld [vmem:[#allocation2] sm:$0xff]  ;;  %254 = vmatpush.msra.mxu1 %v28_v0  ;;  %v30_v3 = vld [vmem:[#allocation2 + $0x8] sm:$0xff]  ;;  %v62_v4 = vld [vmem:[#allocation2 + $0x18] sm:$0xff]  ;;  %vm204_vm10 = vcmask 64512   ;;  %vm234_vm11 = vcmask 31744  }
   0x7   :  { %v64_v5 = vld [vmem:[#allocation2 + $0x28] sm:$0xff]  ;;  %v61_v6 = vld [vmem:[#allocation2 + $0x10] sm:$0xff]  ;;  %v63_v7 = vld [vmem:[#allocation2 + $0x20] sm:$0xff] }
   0x8   :  { %53 = vmatpush.msra.mxu0 %v27_v1  ;;  %255 = vmatpush.msra.mxu1 %v27_v1  ;;  %v168_v10 = vld [vmem:[#allocation2 + $0x48] sm:$0xff]  ;;  %v259_v11 = vld [vmem:[#allocation2 + $0x58] ss:$0 sm:$0xff]  ;;  %v167_v12 = vld [vmem:[#allocation2 + $0x40] sm:$0xff] }
   0x9   :  { %242 = vmatmul.msk.f32.vlgmr.msra.gmra.mxu0 %vm31_vm0, %v29_v2  ;;  %243 = vmatmul.msk.f32.vlgmr.msra.gmra.mxu1 %vm31_vm0, %v30_v3  ;;  %v166_v13 = vld [vmem:[#allocation2 + $0x38] sm:$0xff]  ;;  %v165_v14 = vld [vmem:[#allocation2 + $0x30] sm:$0xff] }
   0xa   :  { %88 = vmatpush.msrb.mxu1 %v62_v4  ;;  %150 = vmatpush.msra.mxu2 %v64_v5  ;;  %v201_v22 = vld [vmem:[#allocation2 + $0x50] sm:$0xff]  ;;  %v260_v25 = vld [vmem:[#allocation2 + $0x59] ss:$0 sm:$0xff]  ;;  %v261_v61 = vld [vmem:[#allocation2 + $0x5a] ss:$0 sm:$0xff] }
   0xb   :  { %188 = vmatpush.msra.mxu3 %v168_v10  ;;  %226 = vmatpush.msrb.mxu0 %v201_v22 }
   0xc   :  { %89 = vmatpush.msrb.mxu1 %v61_v6  ;;  %151 = vmatpush.msra.mxu2 %v63_v7 }
   0xd   :  { %189 = vmatpush.msra.mxu3 %v167_v12 }
   0xf   :  { %190 = vmatpush.msra.mxu3 %v166_v13 }
  0x11   :  { %191 = vmatpush.msra.mxu3 %v165_v14 }
  0x86   :  { %v55_v8 = vpop.f32.mrf.mxu0  ;;  %v58_v9 = vpop.f32.mrf.mxu1 }
  0x87   :  { %244 = vmatmul.msk.f32.vlgmr.msrb.gmra.mxu1 %vm31_vm0, %v55_v8  ;;  %248 = vmatmul.msk.f32.vlgmr.msra.gmra.mxu2 %vm31_vm0, %v55_v8 }
  0x8f   :  { %245 = vmatmul.msk.f32.gmra.mxu1 %vm31_vm0, %v58_v9  ;;  %249 = vmatmul.msk.f32.gmra.mxu2 %vm31_vm0, %v58_v9 }
 0x104   :  { %v91_v15 = vpop.f32.mrf.mxu1 }
 0x105   :  { %v92_v16 = vadd.f32 %v259_v11, %v91_v15 }
 0x107   :  { %v246_v17 = vmul.f32 -1.442695, %v92_v16 }
 0x109   :  { %262 = vpow2.f32 %v246_v17 }
 0x10a   :  { %v153_v24 = vpop.f32.mrf.mxu2 }
 0x10b   :  { %v154_v30 = vadd.f32 %v260_v25, %v153_v24 }
 0x10c   :  { %v94_v18 = vpop.f32.mrf.mxu1 }
 0x10d   :  { %v95_v19 = vadd.f32 %v259_v11, %v94_v18 }
 0x10f   :  { %v263_v20 = vpop.eup %262  ;;  %v247_v21 = vmul.f32 -1.442695, %v95_v19 }
 0x110   :  { %v103_v23 = vadd.f32 1.0, %v263_v20 }
 0x111   :  { %264 = vpow2.f32 %v247_v21 }
 0x112   :  { %266 = vrcp.f32 %v103_v23  ;;  %v116_v32 = vand.u32 2147483648, %v103_v23  ;;  %v114_v34 = vand.u32 2147483647, %v103_v23  ;;  %v156_v35 = vpop.f32.mrf.mxu2  ;;  %vm110_vm2 = vweird.f32 %v103_v23 }
 0x113   :  { %v157_v41 = vadd.f32 %v260_v25, %v156_v35 }
 0x114   :  { %v117_v38 = vor.u32 1.1754944e-38, %v116_v32  ;;  %vm115_vm4 = vcmp.eq.f32.partialorder %v114_v34, 8.507059e+37 }
 0x117   :  { %v265_v26 = vpop.eup %264 }
 0x118   :  { %v267_v27 = vpop.eup %266  ;;  %v104_v28 = vadd.f32 1.0, %v265_v26 }
 0x119   :  { %v106_v29 = vmul.f32 %v267_v27, %v103_v23  ;;  %vm111_vm1 = vweird.f32 %v267_v27 }
 0x11a   :  { %268 = vrcp.f32 %v104_v28  ;;  %vm112_vm3 = vmor %vm110_vm2, %vm111_vm1  ;;  %v131_v46 = vand.u32 2147483648, %v104_v28  ;;  %v129_v49 = vand.u32 2147483647, %v104_v28  ;;  %vm125_vm7 = vweird.f32 %v104_v28 }
 0x11b   :  { %v107_v31 = vsub.f32 1.0, %v106_v29  ;;  %270 = vtanh.f32 %v154_v30 }
 0x11c   :  { %272 = vtanh.f32 %v157_v41  ;;  %v132_v51 = vor.u32 1.1754944e-38, %v131_v46  ;;  %vm130_vm9 = vcmp.eq.f32.partialorder %v129_v49, 8.507059e+37 }
 0x11d   :  { %v108_v33 = vmul.f32 %v267_v27, %v107_v31 }
 0x11f   :  { %v109_v36 = vadd.f32 %v267_v27, %v108_v33 }
 0x120   :  { %v269_v37 = vpop.eup %268 }
 0x121   :  { %v121_v39 = vmul.f32 %v269_v37, %v104_v28  ;;  %v113_v40 = vsel %vm112_vm3, %v267_v27, %v109_v36  ;;  %v271_v45 = vpop.eup %270  ;;  %vm126_vm6 = vweird.f32 %v269_v37 }
 0x122   :  { %v118_v42 = vsel %vm115_vm4, %v117_v38, %v113_v40  ;;  %vm127_vm8 = vmor %vm125_vm7, %vm126_vm6  ;;  %v273_v55 = vpop.eup %272 }
 0x123   :  { %v122_v43 = vsub.f32 1.0, %v121_v39  ;;  %v161_v44 = vsub.f32 1.0, %v118_v42 }
 0x125   :  { %v163_v47 = vmul.f32 %v271_v45, %v161_v44  ;;  %v123_v48 = vmul.f32 %v269_v37, %v122_v43 }
 0x127   :  { %250 = vmatmul.msk.f32.vlgmr.msra.gmra.mxu3 %vm169_vm5, %v163_v47  ;;  %v124_v50 = vadd.f32 %v269_v37, %v123_v48 }
 0x129   :  { %v128_v52 = vsel %vm127_vm8, %v269_v37, %v124_v50 }
 0x12a   :  { %v133_v53 = vsel %vm130_vm9, %v132_v51, %v128_v52 }
 0x12b   :  { %v162_v54 = vsub.f32 1.0, %v133_v53 }
 0x12d   :  { %v164_v56 = vmul.f32 %v273_v55, %v162_v54 }
 0x12f   :  { %251 = vmatmul.msk.f32.gmra.mxu3 %vm169_vm5, %v164_v56 }
 0x1aa   :  { %v193_v57 = vpop.f32.mrf.mxu3 }
 0x1ab   :  { %v199_v58 = vmax.f32 %v193_v57, 0.0 }
 0x1ad   :  { %252 = vmatmul.msk.f32.vlgmr.msrb.gmra.mxu0 %vm204_vm10, %v199_v58 }
 0x1b2   :  { %v196_v59 = vpop.f32.mrf.mxu3 }
 0x1b3   :  { %v200_v60 = vmax.f32 %v196_v59, 0.0 }
 0x1b5   :  { %253 = vmatmul.msk.f32.gmra.mxu0 %vm204_vm10, %v200_v60 }
 0x22a   :  { %v228_v62 = vpop.f32.mrf.mxu0 }
 0x22b   :  { %v229_v63 = vadd.f32 %v261_v61, %v228_v62 }
 0x22d   :  { %235 = vst.msk [vmem:[%s343_s2] sm:$0xff] %vm234_vm11, %v229_v63 }
 0x232   :  { %v231_v0 = vpop.f32.mrf.mxu0 }
 0x233   :  { %v232_v1 = vadd.f32 %v261_v61, %v231_v0 }
 0x235   :  { %236 = vst.msk [vmem:[%s343_s2 + $0x8] sm:$0xff] %vm234_vm11, %v232_v1 }
 0x236   :  { %241 = vsyncpa [#allocation3], 1 }

</bundles_post_ra>
